<compile_context>
chip_gen: v7x
topology: tpu7x:2x2x1
jax: 0.10.0
libtpu: 0.0.40
codegen_flags: <defaults>
</compile_context>

<pallas_src>
import jax
import jax.numpy as jnp
from jax.experimental import pallas as pl
from jax.experimental.pallas import tpu as pltpu

# ---------------- config (small, synthetic) ----------------
BATCH = 2
SEQ_LEN = 16
VOCAB_SIZE = 50
EMBED_DIM = 32
NUM_FILTERS = 16
KERNEL_SIZES = (3, 4, 5)
NUM_CLASSES = 4
# dropout_prob is irrelevant at inference (identity in eval mode)

NUM_BRANCHES = len(KERNEL_SIZES)
KMAX = max(KERNEL_SIZES)          # widest conv -> shared im2col width
V_PAD = 128                       # vocab padded to full lanes for the one-hot
F_PAD = 128                       # per-branch filter padding (lane-dense)
C_PAD = 128                       # class padding for the logits store
B_PAD = 8                         # output batch padded to a full sublane tile
NEG_MASK = -1e30                  # "-inf" for the pre-pool validity mask

_VMEM = pl.BlockSpec(memory_space=pltpu.MemorySpace.VMEM)


# ---------------- fused kernel ----------------
def fused_cnn_kernel(ids_ref, embblk_ref, wbig_ref, mask_ref, cbias_ref,
                     fcw_ref, fcb_ref, o_ref):
    """One-hot gather+im2col matmul -> merged conv matmul -> masked max-pool -> bias/ReLU -> fc.

    ids_ref   : (B*L, KMAX) int32   time-shifted token ids (col dk = id at t+dk, mod L)
    embblk_ref: (KMAX*V_PAD, KMAX*E) bf16   block-diagonal padded embedding
    wbig_ref  : (KMAX*E, 3*F_PAD) bf16      merged im2col conv weights (zero rows for dk >= k_i)
    mask_ref  : (B*L, 3*F_PAD) f32          0 where (t, branch) valid, -1e30 otherwise
    cbias_ref : (1, 3*F_PAD) f32            conv biases scattered into F_PAD blocks
    fcw_ref   : (3*F_PAD, C_PAD) bf16       fc weight scattered into padded layout
    fcb_ref   : (1, C_PAD) f32
    o_ref     : (B_PAD, C_PAD) f32
    """
    # --- block one-hot: (B*L, KMAX*V_PAD), full-128-lane pieces only ---
    ids = ids_ref[...]                                                    # (B*L, KMAX)
    viota = jax.lax.broadcasted_iota(jnp.int32, (BATCH * SEQ_LEN, V_PAD), 1)
    onehot = jnp.concatenate(
        [(viota == ids[:, dk:dk + 1]).astype(jnp.bfloat16) for dk in range(KMAX)],
        axis=1)                                                           # (B*L, KMAX*V_PAD)

    # --- gather + im2col in ONE bf16 MXU matmul (f32 accumulate -> exact bf16(emb)) ---
    x = jnp.dot(onehot, embblk_ref[...],
                preferred_element_type=jnp.float32).astype(jnp.bfloat16)  # (B*L, KMAX*E)

    # --- all three conv branches in ONE matmul, M = B*L ---
    acc = jnp.dot(x, wbig_ref[...],
                  preferred_element_type=jnp.float32)                     # (B*L, 3*F_PAD) f32

    # --- mask invalid trailing time positions per branch, then global max-pool (XLU) ---
    acc = acc + mask_ref[...]
    pooled = jnp.max(acc.reshape(BATCH, SEQ_LEN, NUM_BRANCHES * F_PAD), axis=1)  # (B, 3*F_PAD)

    # --- bias + ReLU on the small pooled tensor, all f32 (v5e-friendly epilogue) ---
    pooled = jnp.maximum(pooled + cbias_ref[...], 0.0)

    # --- pad batch to 8 sublanes so the final store is an unmasked full vst ---
    feat = jnp.concatenate(
        [pooled, jnp.zeros((B_PAD - BATCH, NUM_BRANCHES * F_PAD), jnp.float32)],
        axis=0).astype(jnp.bfloat16)                                      # (B_PAD, 3*F_PAD)

    logits = jnp.dot(feat, fcw_ref[...],
                     preferred_element_type=jnp.float32)                  # (B_PAD, C_PAD)
    o_ref[...] = logits + fcb_ref[...]


# ---------------- host-side packing (layout / padding, done once) ----------------
def pack_params(params):
    """Pad + reshape parameters into lane-dense, im2col-ready bf16/f32 layouts."""
    # embedding: pad vocab to 128, cast bf16, build block-diagonal (KMAX*V_PAD, KMAX*E)
    emb_pad = jnp.zeros((V_PAD, EMBED_DIM), jnp.bfloat16)
    emb_pad = emb_pad.at[:VOCAB_SIZE].set(params["embedding"].astype(jnp.bfloat16))
    emb_blk = jnp.zeros((KMAX * V_PAD, KMAX * EMBED_DIM), jnp.bfloat16)
    for dk in range(KMAX):
        emb_blk = emb_blk.at[dk * V_PAD:(dk + 1) * V_PAD,
                             dk * EMBED_DIM:(dk + 1) * EMBED_DIM].set(emb_pad)

    # merged conv weights: branch i occupies columns [i*F_PAD, i*F_PAD+F);
    # rows dk*E..dk*E+E-1 hold tap dk (zero for dk >= k_i -> those taps contribute nothing).
    wbig = jnp.zeros((KMAX * EMBED_DIM, NUM_BRANCHES * F_PAD), jnp.float32)
    cbias = jnp.zeros((1, NUM_BRANCHES * F_PAD), jnp.float32)
    for i, (k, (w, b)) in enumerate(zip(KERNEL_SIZES, params["convs"])):
        w2d = w.reshape(k * EMBED_DIM, NUM_FILTERS)                       # (k*E, F), dk-major
        wbig = wbig.at[:k * EMBED_DIM, i * F_PAD:i * F_PAD + NUM_FILTERS].set(w2d)
        cbias = cbias.at[0, i * F_PAD:i * F_PAD + NUM_FILTERS].set(b[0])

    # validity mask: branch i is valid for t < L - k_i + 1; invalid positions get -1e30
    mask = jnp.zeros((SEQ_LEN, NUM_BRANCHES * F_PAD), jnp.float32)
    for i, k in enumerate(KERNEL_SIZES):
        l_out = SEQ_LEN - k + 1
        mask = mask.at[l_out:, i * F_PAD:(i + 1) * F_PAD].set(NEG_MASK)
    mask = jnp.tile(mask, (BATCH, 1))                                     # (B*L, 3*F_PAD)

    # fc weight scattered into the padded concat layout (padded rows/cols are zero)
    fcw = jnp.zeros((NUM_BRANCHES * F_PAD, C_PAD), jnp.float32)
    for i in range(NUM_BRANCHES):
        fcw = fcw.at[i * F_PAD:i * F_PAD + NUM_FILTERS, :NUM_CLASSES].set(
            params["fc_w"][i * NUM_FILTERS:(i + 1) * NUM_FILTERS, :])
    fcb = jnp.zeros((1, C_PAD), jnp.float32).at[0, :NUM_CLASSES].set(params["fc_b"][0])

    return {
        "emb_blk": emb_blk,                    # (KMAX*V_PAD, KMAX*E) bf16
        "conv_w": wbig.astype(jnp.bfloat16),   # (KMAX*E, 3*F_PAD) bf16
        "conv_b": cbias,                       # (1, 3*F_PAD) f32
        "pool_mask": mask,                     # (B*L, 3*F_PAD) f32
        "fc_w": fcw.astype(jnp.bfloat16),      # (3*F_PAD, C_PAD) bf16
        "fc_b": fcb,                           # (1, C_PAD) f32
    }


def _cost_estimate():
    flops = 2 * (BATCH * SEQ_LEN) * (KMAX * V_PAD) * (KMAX * EMBED_DIM)        # gather+im2col
    flops += 2 * (BATCH * SEQ_LEN) * (KMAX * EMBED_DIM) * (NUM_BRANCHES * F_PAD)  # merged conv
    flops += 2 * B_PAD * (NUM_BRANCHES * F_PAD) * C_PAD                        # fc
    bytes_accessed = (
        BATCH * SEQ_LEN * KMAX * 4                                 # ids
        + (KMAX * V_PAD) * (KMAX * EMBED_DIM) * 2                  # emb block
        + (KMAX * EMBED_DIM) * (NUM_BRANCHES * F_PAD) * 2          # conv weights
        + BATCH * SEQ_LEN * NUM_BRANCHES * F_PAD * 4               # pool mask
        + NUM_BRANCHES * F_PAD * 4                                 # conv bias
        + (NUM_BRANCHES * F_PAD) * C_PAD * 2                       # fc weight
        + C_PAD * 4                                                # fc bias
        + B_PAD * C_PAD * 4)                                       # output
    return pl.CostEstimate(flops=flops, transcendentals=0, bytes_accessed=bytes_accessed)


_COST = _cost_estimate()


@jax.jit
def cnn_classifier_forward(token_ids, packed):
    """Non-ELMo branch of CNNClassifier.forward (eval mode: dropout = identity)."""
    # TODO(synk): training-mode dropout not implemented; eval-mode dropout is identity.
    # Layout plumbing only: time-shifted ids (col dk = id at position t+dk, mod L) so the
    # kernel's im2col needs no unaligned sublane slices. Wrapped positions are masked pre-pool.
    t_idx = (jnp.arange(SEQ_LEN)[:, None] + jnp.arange(KMAX)[None, :]) % SEQ_LEN   # (L, KMAX)
    ids_block = token_ids.astype(jnp.int32)[:, t_idx].reshape(BATCH * SEQ_LEN, KMAX)

    out = pl.pallas_call(
        fused_cnn_kernel,
        out_shape=jax.ShapeDtypeStruct((B_PAD, C_PAD), jnp.float32),
        in_specs=[_VMEM] * 7,
        out_specs=_VMEM,
        cost_estimate=_COST,
        compiler_params=pltpu.CompilerParams(vmem_limit_bytes=32 * 1024 * 1024),
    )(ids_block, packed["emb_blk"], packed["conv_w"], packed["pool_mask"],
      packed["conv_b"], packed["fc_w"], packed["fc_b"])
    return out[:BATCH, :NUM_CLASSES]                                      # (B, C)


# ---------------- pure-JAX reference (f32) for a sanity check ----------------
def reference_forward(token_ids, params):
    emb = jnp.take(params["embedding"], token_ids, axis=0)                # (B, L, E)
    feats = []
    for ksize, (w, b) in zip(KERNEL_SIZES, params["convs"]):
        l_out = SEQ_LEN - ksize + 1
        acc = jnp.zeros((BATCH, l_out, NUM_FILTERS), jnp.float32)
        for dk in range(ksize):
            acc = acc + jnp.einsum("ble,ef->blf", emb[:, dk:dk + l_out, :], w[dk],
                                   preferred_element_type=jnp.float32)
        acc = jnp.maximum(acc + b[None, :, :], 0.0)
        feats.append(jnp.max(acc, axis=1))
    x = jnp.concatenate(feats, axis=1)
    return x @ params["fc_w"] + params["fc_b"]


# ---------------- deterministic parameter init ----------------
def init_params(key):
    keys = jax.random.split(key, 4 + 2 * len(KERNEL_SIZES))
    params = {}
    params["embedding"] = jax.random.normal(keys[0], (VOCAB_SIZE, EMBED_DIM), jnp.float32)
    convs = []
    for i, k in enumerate(KERNEL_SIZES):
        wk = 0.1 * jax.random.normal(keys[1 + 2 * i], (k, EMBED_DIM, NUM_FILTERS), jnp.float32)
        bk = 0.1 * jax.random.normal(keys[2 + 2 * i], (1, NUM_FILTERS), jnp.float32)
        convs.append((wk, bk))
    params["convs"] = convs
    params["fc_w"] = 0.1 * jax.random.normal(
        keys[-2], (len(KERNEL_SIZES) * NUM_FILTERS, NUM_CLASSES), jnp.float32)
    params["fc_b"] = 0.1 * jax.random.normal(keys[-1], (1, NUM_CLASSES), jnp.float32)
    return params


if __name__ == "__main__":
    root = jax.random.PRNGKey(0)
    k_params, k_inputs = jax.random.split(root)
    params = init_params(k_params)
    token_ids = jax.random.randint(k_inputs, (BATCH, SEQ_LEN), 0, VOCAB_SIZE, dtype=jnp.int32)

    packed = pack_params(params)
    logits = cnn_classifier_forward(token_ids, packed)
    jax.block_until_ready(logits)
    assert logits.shape == (BATCH, NUM_CLASSES), logits.shape

    # numeric sanity check vs f32 reference (bf16 MXU operands -> loose tolerance)
    ref = reference_forward(token_ids, params)
    max_err = float(jnp.max(jnp.abs(logits - ref)))
    assert max_err < 5e-2, f"max abs err {max_err}"

    print("KERNEL_OK")
</pallas_src>

<mosaic_0001>
module attributes {stable_mosaic.version = 11 : i64} {
  func.func @fused_cnn_kernel(%arg0: memref<32x5xi32, #tpu.memory_space<vmem>>, %arg1: memref<640x160xbf16, #tpu.memory_space<vmem>>, %arg2: memref<160x384xbf16, #tpu.memory_space<vmem>>, %arg3: memref<32x384xf32, #tpu.memory_space<vmem>>, %arg4: memref<1x384xf32, #tpu.memory_space<vmem>>, %arg5: memref<384x128xbf16, #tpu.memory_space<vmem>>, %arg6: memref<1x128xf32, #tpu.memory_space<vmem>>, %arg7: memref<8x128xf32, #tpu.memory_space<vmem>>) attributes {dimension_semantics = [], scalar_prefetch = 0 : i64, scratch_operands = 0 : i64, tpu.core_type = #tpu.core_type<tc>} {
    %c0 = arith.constant 0 : index
    %c0_0 = arith.constant 0 : index
    %0 = vector.load %arg0[%c0, %c0_0] : memref<32x5xi32, #tpu.memory_space<vmem>>, vector<32x5xi32>
    %1 = tpu.iota {dimensions = array<i32: 1>} : vector<32x128xi32>
    %2 = vector.extract_strided_slice %0 {offsets = [0, 0], sizes = [32, 1], strides = [1, 1]} : vector<32x5xi32> to vector<32x1xi32>
    %3 = vector.broadcast %2 : vector<32x1xi32> to vector<32x128xi32>
    %4 = arith.cmpi eq, %1, %3 : vector<32x128xi32>
    %5 = arith.extui %4 : vector<32x128xi1> to vector<32x128xi32>
    %6 = arith.sitofp %5 : vector<32x128xi32> to vector<32x128xf32>
    %7 = arith.truncf %6 : vector<32x128xf32> to vector<32x128xbf16>
    %8 = vector.extract_strided_slice %0 {offsets = [0, 1], sizes = [32, 1], strides = [1, 1]} : vector<32x5xi32> to vector<32x1xi32>
    %9 = vector.broadcast %8 : vector<32x1xi32> to vector<32x128xi32>
    %10 = arith.cmpi eq, %1, %9 : vector<32x128xi32>
    %11 = arith.extui %10 : vector<32x128xi1> to vector<32x128xi32>
    %12 = arith.sitofp %11 : vector<32x128xi32> to vector<32x128xf32>
    %13 = arith.truncf %12 : vector<32x128xf32> to vector<32x128xbf16>
    %14 = vector.extract_strided_slice %0 {offsets = [0, 2], sizes = [32, 1], strides = [1, 1]} : vector<32x5xi32> to vector<32x1xi32>
    %15 = vector.broadcast %14 : vector<32x1xi32> to vector<32x128xi32>
    %16 = arith.cmpi eq, %1, %15 : vector<32x128xi32>
    %17 = arith.extui %16 : vector<32x128xi1> to vector<32x128xi32>
    %18 = arith.sitofp %17 : vector<32x128xi32> to vector<32x128xf32>
    %19 = arith.truncf %18 : vector<32x128xf32> to vector<32x128xbf16>
    %20 = vector.extract_strided_slice %0 {offsets = [0, 3], sizes = [32, 1], strides = [1, 1]} : vector<32x5xi32> to vector<32x1xi32>
    %21 = vector.broadcast %20 : vector<32x1xi32> to vector<32x128xi32>
    %22 = arith.cmpi eq, %1, %21 : vector<32x128xi32>
    %23 = arith.extui %22 : vector<32x128xi1> to vector<32x128xi32>
    %24 = arith.sitofp %23 : vector<32x128xi32> to vector<32x128xf32>
    %25 = arith.truncf %24 : vector<32x128xf32> to vector<32x128xbf16>
    %26 = vector.extract_strided_slice %0 {offsets = [0, 4], sizes = [32, 1], strides = [1, 1]} : vector<32x5xi32> to vector<32x1xi32>
    %27 = vector.broadcast %26 : vector<32x1xi32> to vector<32x128xi32>
    %28 = arith.cmpi eq, %1, %27 : vector<32x128xi32>
    %29 = arith.extui %28 : vector<32x128xi1> to vector<32x128xi32>
    %30 = arith.sitofp %29 : vector<32x128xi32> to vector<32x128xf32>
    %31 = arith.truncf %30 : vector<32x128xf32> to vector<32x128xbf16>
    %32 = tpu.concatenate %7, %13, %19, %25, %31 in 1 : vector<32x128xbf16>, vector<32x128xbf16>, vector<32x128xbf16>, vector<32x128xbf16>, vector<32x128xbf16> -> vector<32x640xbf16>
    %c0_1 = arith.constant 0 : index
    %c0_2 = arith.constant 0 : index
    %33 = vector.load %arg1[%c0_1, %c0_2] : memref<640x160xbf16, #tpu.memory_space<vmem>>, vector<640x160xbf16>
    %cst = arith.constant dense<0.000000e+00> : vector<32x160xf32>
    %34 = tpu.matmul %32, %33, %cst {dimension_numbers = #tpu.dot_dimension_numbers<[1], [0], [0], [1], [0, 0, 1, 1], [], []>} : vector<32x640xbf16>, vector<640x160xbf16>, vector<32x160xf32> -> vector<32x160xf32>
    %35 = arith.truncf %34 : vector<32x160xf32> to vector<32x160xbf16>
    %c0_3 = arith.constant 0 : index
    %c0_4 = arith.constant 0 : index
    %36 = vector.load %arg2[%c0_3, %c0_4] : memref<160x384xbf16, #tpu.memory_space<vmem>>, vector<160x384xbf16>
    %cst_5 = arith.constant dense<0.000000e+00> : vector<32x384xf32>
    %37 = tpu.matmul %35, %36, %cst_5 {dimension_numbers = #tpu.dot_dimension_numbers<[1], [0], [0], [1], [0, 0, 1, 1], [], []>} : vector<32x160xbf16>, vector<160x384xbf16>, vector<32x384xf32> -> vector<32x384xf32>
    %c0_6 = arith.constant 0 : index
    %c0_7 = arith.constant 0 : index
    %38 = vector.load %arg3[%c0_6, %c0_7] : memref<32x384xf32, #tpu.memory_space<vmem>>, vector<32x384xf32>
    %39 = arith.addf %37, %38 : vector<32x384xf32>
    %40 = vector.shape_cast %39 : vector<32x384xf32> to vector<2x16x384xf32>
    %cst_8 = arith.constant dense<0xFF800000> : vector<2x384xf32>
    %41 = vector.multi_reduction <maximumf>, %40, %cst_8 [1] : vector<2x16x384xf32> to vector<2x384xf32>
    %c0_9 = arith.constant 0 : index
    %c0_10 = arith.constant 0 : index
    %42 = vector.load %arg4[%c0_9, %c0_10] : memref<1x384xf32, #tpu.memory_space<vmem>>, vector<1x384xf32>
    %43 = vector.broadcast %42 : vector<1x384xf32> to vector<2x384xf32>
    %44 = arith.addf %41, %43 : vector<2x384xf32>
    %cst_11 = arith.constant 0.000000e+00 : f32
    %45 = vector.broadcast %cst_11 : f32 to vector<2x384xf32>
    %46 = arith.maximumf %44, %45 : vector<2x384xf32>
    %cst_12 = arith.constant 0.000000e+00 : f32
    %47 = vector.broadcast %cst_12 : f32 to vector<6x384xf32>
    %48 = tpu.concatenate %46, %47 in 0 : vector<2x384xf32>, vector<6x384xf32> -> vector<8x384xf32>
    %49 = arith.truncf %48 : vector<8x384xf32> to vector<8x384xbf16>
    %c0_13 = arith.constant 0 : index
    %c0_14 = arith.constant 0 : index
    %50 = vector.load %arg5[%c0_13, %c0_14] : memref<384x128xbf16, #tpu.memory_space<vmem>>, vector<384x128xbf16>
    %cst_15 = arith.constant dense<0.000000e+00> : vector<8x128xf32>
    %51 = tpu.matmul %49, %50, %cst_15 {dimension_numbers = #tpu.dot_dimension_numbers<[1], [0], [0], [1], [0, 0, 1, 1], [], []>} : vector<8x384xbf16>, vector<384x128xbf16>, vector<8x128xf32> -> vector<8x128xf32>
    %c0_16 = arith.constant 0 : index
    %c0_17 = arith.constant 0 : index
    %52 = vector.load %arg6[%c0_16, %c0_17] : memref<1x128xf32, #tpu.memory_space<vmem>>, vector<1x128xf32>
    %53 = vector.broadcast %52 : vector<1x128xf32> to vector<8x128xf32>
    %54 = arith.addf %51, %53 : vector<8x128xf32>
    %c0_18 = arith.constant 0 : index
    %c0_19 = arith.constant 0 : index
    %55 = vector.load %arg7[%c0_18, %c0_19] : memref<8x128xf32, #tpu.memory_space<vmem>>, vector<8x128xf32>
    tpu.vector_store %arg7[%c0_18, %c0_19], %54 {strides = array<i32>} : memref<8x128xf32, #tpu.memory_space<vmem>>, vector<8x128xf32>,
    return
  }
}

</mosaic_0001>

<bundles_post_ra>
// kernel: cnn_classifier_forward.1
= control target key start
LH: loop header
LB: loop body
LE: loop exit
PB: predicated region body
PF: predicated region fallthrough
CT: control target
= control target key end

     0   :  { %v1965_v0 = vmov 1   ;;  %v1966_v1 = vmov 0   ;;  %v1967_v15 = vmov 3   ;;  %v1968_v18 = vmov 2   ;;  %s2578_s0 = inlined_call_operand.vmem [shape: s32[32,5], index: 0, kind: input, shape index: {}]   ;;  %s2579_s1 = inlined_call_operand.vmem [shape: bf16[640,160], index: 1, kind: input, shape index: {}]   ;;  %s2580_s2 = inlined_call_operand.vmem [shape: bf16[160,384], index: 2, kind: input, shape index: {}]   ;;  %s2581_s5 = inlined_call_operand.vmem [shape: bf16[384,128], index: 5, kind: input, shape index: {}]   ;;  %s2582_s3 = inlined_call_operand.vmem [shape: f32[32,384], index: 3, kind: input, shape index: {}]   ;;  %s2583_s4 = inlined_call_operand.vmem [shape: f32[1,384], index: 4, kind: input, shape index: {}]   ;;  %s2584_s6 = inlined_call_operand.vmem [shape: f32[1,128], index: 6, kind: input, shape index: {}]   ;;  %s2585_s7 = inlined_call_operand.vmem [shape: f32[8,128], index: 7, kind: output, shape index: {}]  }
   0x1   :  { %1768 = vset.pattern.permute.xlu0 %v1965_v0  ;;  %1769 = vset.pattern.permute.xlu1 %v1966_v1  ;;  %v2017_v2 = vld [vmem:[%s2578_s0] sm:$0xff]  ;;  %v28_v3 = vld [vmem:[%s2578_s0 + $0x8] sm:$0xff]  ;;  %v1784_v6 = vld [vmem:[%s2579_s1 + $0x14] ss:$8 sps:$4 sm:$0xff]   ;;  %v1969_v25 = vmov 4   ;;  %v31_v48 = vlaneseq }
   0x2   :  { %34 = vperm.xlu1 %1769, %v2017_v2   ;;  %60 = vperm.xlu0 %1768, %v2017_v2   ;;  %v1781_v4 = vld [vmem:[%s2579_s1 + $0x4] ss:$8 sps:$4 sm:$0xff]   ;;  %v1783_v5 = vld [vmem:[%s2579_s1] ss:$8 sps:$4 sm:$0xff]   ;;  %v2036_v7 = vld [vmem:[%s2578_s0 + $0x10] sm:$0xff] }
   0x3   :  { %643 = vmatprep.subr.bf16.mxu0 %v1781_v4  ;;  %v1786_v8 = vld [vmem:[%s2579_s1 + $0x10] ss:$8 sps:$4 sm:$0xff]   ;;  %v1787_v10 = vld [vmem:[%s2579_s1 + $0x24] ss:$8 sps:$4 sm:$0xff]   ;;  %v1789_v11 = vld [vmem:[%s2579_s1 + $0x20] ss:$8 sps:$4 sm:$0xff]  }
   0x4   :  { %644 = vmatpush1.bf16.msra.mxu0 %v1783_v5  ;;  %v2044_v9 = vld [vmem:[%s2578_s0 + $0x18] sm:$0xff]  ;;  %v1793_v14 = vld [vmem:[%s2579_s1 + $0x44] ss:$8 sps:$4 sm:$0xff]   ;;  %v1795_v16 = vld [vmem:[%s2579_s1 + $0x40] ss:$8 sps:$4 sm:$0xff]   ;;  %v2176_v52 = vand.u32 127, %v31_v48 }
   0x5   :  { %645 = vmatprep.subr.bf16.mxu0 %v1784_v6  ;;  %v1790_v12 = vld [vmem:[%s2579_s1 + $0x34] ss:$8 sps:$4 sm:$0xff]   ;;  %v1792_v13 = vld [vmem:[%s2579_s1 + $0x30] ss:$8 sps:$4 sm:$0xff]   ;;  %v1799_v20 = vld [vmem:[%s2579_s1 + $0x64] ss:$8 sps:$4 sm:$0xff]  }
   0x6   :  { %37 = vperm.xlu1 %1769, %v28_v3   ;;  %63 = vperm.xlu0 %1768, %v28_v3   ;;  %v1796_v17 = vld [vmem:[%s2579_s1 + $0x54] ss:$8 sps:$4 sm:$0xff]   ;;  %v1798_v19 = vld [vmem:[%s2579_s1 + $0x50] ss:$8 sps:$4 sm:$0xff]   ;;  %v1801_v21 = vld [vmem:[%s2579_s1 + $0x60] ss:$8 sps:$4 sm:$0xff]  }
   0x7   :  { %v1802_v22 = vld [vmem:[%s2579_s1 + $0x74] ss:$8 sps:$4 sm:$0xff]   ;;  %v1804_v23 = vld [vmem:[%s2579_s1 + $0x70] ss:$8 sps:$4 sm:$0xff]   ;;  %v1805_v24 = vld [vmem:[%s2579_s1 + $0x84] ss:$8 sps:$4 sm:$0xff]  }
   0x8   :  { %646 = vmatpush1.bf16.msra.mxu0 %v1786_v8  ;;  %v1807_v26 = vld [vmem:[%s2579_s1 + $0x80] ss:$8 sps:$4 sm:$0xff]   ;;  %v1808_v27 = vld [vmem:[%s2579_s1 + $0x94] ss:$8 sps:$4 sm:$0xff]   ;;  %v1810_v28 = vld [vmem:[%s2579_s1 + $0x90] ss:$8 sps:$4 sm:$0xff]  }
   0x9   :  { %647 = vmatprep.subr.bf16.mxu0 %v1787_v10  ;;  %v1811_v29 = vld [vmem:[%s2579_s1 + $0xa4] ss:$8 sps:$4 sm:$0xff]   ;;  %v1813_v30 = vld [vmem:[%s2579_s1 + $0xa0] ss:$8 sps:$4 sm:$0xff]   ;;  %v1814_v31 = vld [vmem:[%s2579_s1 + $0xb4] ss:$8 sps:$4 sm:$0xff]  }
   0xa   :  { %1770 = vset.pattern.permute.xlu1 %v1965_v0  ;;  %66 = vperm.xlu0 %1768, %v2036_v7   ;;  %v1816_v32 = vld [vmem:[%s2579_s1 + $0xb0] ss:$8 sps:$4 sm:$0xff]   ;;  %v1817_v33 = vld [vmem:[%s2579_s1 + $0xc4] ss:$8 sps:$4 sm:$0xff]   ;;  %v1819_v34 = vld [vmem:[%s2579_s1 + $0xc0] ss:$8 sps:$4 sm:$0xff]  }
   0xb   :  { %69 = vperm.xlu1 %1770, %v2044_v9   ;;  %v1820_v35 = vld [vmem:[%s2579_s1 + $0xd4] ss:$8 sps:$4 sm:$0xff]   ;;  %v1822_v36 = vld [vmem:[%s2579_s1 + $0xd0] ss:$8 sps:$4 sm:$0xff]   ;;  %v1823_v37 = vld [vmem:[%s2579_s1 + $0xe4] ss:$8 sps:$4 sm:$0xff]  }
   0xc   :  { %648 = vmatpush1.bf16.msra.mxu0 %v1789_v11  ;;  %v1825_v38 = vld [vmem:[%s2579_s1 + $0xe0] ss:$8 sps:$4 sm:$0xff]   ;;  %v1826_v39 = vld [vmem:[%s2579_s1 + $0xf4] ss:$8 sps:$4 sm:$0xff]   ;;  %v1828_v40 = vld [vmem:[%s2579_s1 + $0xf0] ss:$8 sps:$4 sm:$0xff]  }
   0xd   :  { %649 = vmatprep.subr.bf16.mxu0 %v1790_v12  ;;  %v1831_v41 = vld [vmem:[%s2579_s1 + $0x104] ss:$8 sps:$4 sm:$0xff]   ;;  %v1904_v44 = vld [vmem:[%s2580_s2 + $0x1c] ss:$12 sps:$4 sm:$0xff]   ;;  %v1907_v46 = vld [vmem:[%s2580_s2 + $0x34] ss:$12 sps:$4 sm:$0xff]  }
   0xe   :  { %1771 = vset.pattern.permute.xlu0 %v1966_v1  ;;  %v1901_v42 = vld [vmem:[%s2580_s2 + $0x4] ss:$12 sps:$4 sm:$0xff]   ;;  %v1903_v43 = vld [vmem:[%s2580_s2] ss:$12 sps:$4 sm:$0xff]   ;;  %v1912_v50 = vld [vmem:[%s2580_s2 + $0x48] ss:$12 sps:$4 sm:$0xff]  }
   0xf   :  { %1772 = vset.pattern.permute.xlu1 %v1966_v1  ;;  %40 = vperm.xlu0 %1771, %v2036_v7   ;;  %v1906_v45 = vld [vmem:[%s2580_s2 + $0x18] ss:$12 sps:$4 sm:$0xff]   ;;  %v1909_v47 = vld [vmem:[%s2580_s2 + $0x30] ss:$12 sps:$4 sm:$0xff]   ;;  %v1915_v53 = vld [vmem:[%s2580_s2 + $0x60] ss:$12 sps:$4 sm:$0xff]  }
  0x10   :  { %43 = vperm.xlu1 %1772, %v2044_v9   ;;  %650 = vmatpush1.bf16.msra.mxu0 %v1792_v13  ;;  %v1910_v49 = vld [vmem:[%s2580_s2 + $0x4c] ss:$12 sps:$4 sm:$0xff]   ;;  %v1913_v51 = vld [vmem:[%s2580_s2 + $0x64] ss:$12 sps:$4 sm:$0xff]   ;;  %v1916_v56 = vld [vmem:[%s2580_s2 + $0x7c] ss:$12 sps:$4 sm:$0xff]  }
  0x11   :  { %651 = vmatprep.subr.bf16.mxu0 %v1793_v14  ;;  %1025 = vmatprep.subr.bf16.mxu1 %v1901_v42  ;;  %v1918_v59 = vld [vmem:[%s2580_s2 + $0x78] ss:$12 sps:$4 sm:$0xff]   ;;  %v1829_v60 = vld [vmem:[%s2579_s1 + $0x100] ss:$8 sps:$4 sm:$0xff]   ;;  %v1834_v62 = vld [vmem:[%s2579_s1 + $0x114] ss:$8 sps:$4 sm:$0xff]  }
  0x12   :  { %1026 = vmatpush1.bf16.msra.mxu1 %v1903_v43  ;;  %v1919_v61 = vld [vmem:[%s2580_s2 + $0x94] ss:$12 sps:$4 sm:$0xff]   ;;  %v1970_v63 = vmov 1.0|1.0   ;;  %v1832_v4 = vld [vmem:[%s2579_s1 + $0x110] ss:$8 sps:$4 sm:$0xff]  }
  0x13   :  { %1774 = vset.pattern.permute.xlu0 %v1967_v15  ;;  %1027 = vmatprep.subr.bf16.mxu1 %v1904_v44  ;;  %v1922_v5 = vld [vmem:[%s2580_s2 + $0xac] ss:$12 sps:$4 sm:$0xff]   ;;  %v1924_v8 = vld [vmem:[%s2580_s2 + $0xa8] ss:$12 sps:$4 sm:$0xff]   ;;  %v1925_v11 = vld [vmem:[%s2580_s2 + $0xc4] ss:$12 sps:$4 sm:$0xff]  }
  0x14   :  { %1773 = vset.pattern.permute.xlu1 %v1967_v15  ;;  %115 = vperm.xlu0 %1774, %v28_v3   ;;  %v1837_v6 = vld [vmem:[%s2579_s1 + $0x124] ss:$8 sps:$4 sm:$0xff]   ;;  %v1840_v12 = vld [vmem:[%s2579_s1 + $0x134] ss:$8 sps:$4 sm:$0xff]   ;;  %v1838_v14 = vld [vmem:[%s2579_s1 + $0x130] ss:$8 sps:$4 sm:$0xff]  }
  0x15   :  { %112 = vperm.xlu1 %1773, %v2017_v2   ;;  %652 = vmatpush1.bf16.msra.mxu0 %v1795_v16  ;;  %v1927_v13 = vld [vmem:[%s2580_s2 + $0xc0] ss:$12 sps:$4 sm:$0xff]   ;;  %v1874_v44 = vld [vmem:[%s2579_s1 + $0x1f0] ss:$8 sps:$4 sm:$0xff]  }
  0x16   :  { %653 = vmatprep.subr.bf16.mxu0 %v1796_v17  ;;  %1028 = vmatpush1.bf16.msra.mxu1 %v1906_v45  ;;  %v1843_v16 = vld [vmem:[%s2579_s1 + $0x144] ss:$8 sps:$4 sm:$0xff]  }
  0x17   :  { %1029 = vmatprep.subr.bf16.mxu1 %v1907_v46  ;;  %v1879_v45 = vld [vmem:[%s2579_s1 + $0x204] ss:$8 sps:$4 sm:$0xff]   ;;  %v1877_v46 = vld [vmem:[%s2579_s1 + $0x200] ss:$8 sps:$4 sm:$0xff]  }
  0x18   :  { %118 = vperm.xlu0 %1774, %v2036_v7  }
  0x19   :  { %1775 = vset.pattern.permute.xlu1 %v1968_v18  ;;  %654 = vmatpush1.bf16.msra.mxu0 %v1798_v19  ;;  %v1846_v19 = vld [vmem:[%s2579_s1 + $0x154] ss:$8 sps:$4 sm:$0xff]  }
  0x1a   :  { %86 = vperm.xlu1 %1775, %v2017_v2   ;;  %655 = vmatprep.subr.bf16.mxu0 %v1799_v20  ;;  %v1844_v20 = vld [vmem:[%s2579_s1 + $0x150] ss:$8 sps:$4 sm:$0xff]  }
  0x1b   :  { %1030 = vmatpush1.bf16.msra.mxu1 %v1909_v47  ;;  %v1882_v47 = vld [vmem:[%s2579_s1 + $0x214] ss:$8 sps:$4 sm:$0xff]  }
  0x1c   :  { %1777 = vset.pattern.permute.xlu0 %v1968_v18  ;;  %1031 = vmatprep.subr.bf16.mxu1 %v1910_v49 }
  0x1d   :  { %92 = vperm.xlu0 %1777, %v2036_v7   ;;  %656 = vmatpush1.bf16.msra.mxu0 %v1801_v21  ;;  %v1849_v21 = vld [vmem:[%s2579_s1 + $0x164] ss:$8 sps:$4 sm:$0xff]  }
  0x1e   :  { %89 = vperm.xlu1 %1775, %v28_v3   ;;  %657 = vmatprep.subr.bf16.mxu0 %v1802_v22  ;;  %v1847_v22 = vld [vmem:[%s2579_s1 + $0x160] ss:$8 sps:$4 sm:$0xff]  }
  0x1f   :  { %1032 = vmatpush1.bf16.msra.mxu1 %v1912_v50  ;;  %v1880_v50 = vld [vmem:[%s2579_s1 + $0x210] ss:$8 sps:$4 sm:$0xff]  }
  0x20   :  { %1033 = vmatprep.subr.bf16.mxu1 %v1913_v51 }
  0x21   :  { %1780 = vset.pattern.permute.xlu0 %v1969_v25  ;;  %658 = vmatpush1.bf16.msra.mxu0 %v1804_v23  ;;  %v1852_v23 = vld [vmem:[%s2579_s1 + $0x174] ss:$8 sps:$4 sm:$0xff]  }
  0x22   :  { %1776 = vset.pattern.permute.xlu1 %v1967_v15  ;;  %141 = vperm.xlu0 %1780, %v28_v3   ;;  %v1921_v3 = vld [vmem:[%s2580_s2 + $0x90] ss:$12 sps:$4 sm:$0xff]  }
  0x23   :  { %121 = vperm.xlu1 %1776, %v2044_v9   ;;  %659 = vmatprep.subr.bf16.mxu0 %v1805_v24  ;;  %v1850_v24 = vld [vmem:[%s2579_s1 + $0x170] ss:$8 sps:$4 sm:$0xff]  }
  0x24   :  { %1034 = vmatpush1.bf16.msra.mxu1 %v1915_v53  ;;  %v1885_v53 = vld [vmem:[%s2579_s1 + $0x224] ss:$8 sps:$4 sm:$0xff]  }
  0x25   :  { %660 = vmatpush1.bf16.msra.mxu0 %v1807_v26  ;;  %1035 = vmatprep.subr.bf16.mxu1 %v1916_v56  ;;  %v1853_v26 = vld [vmem:[%s2579_s1 + $0x180] ss:$8 sps:$4 sm:$0xff]   ;;  %v1886_v56 = vld [vmem:[%s2579_s1 + $0x230] ss:$8 sps:$4 sm:$0xff]  }
  0x26   :  { %661 = vmatprep.subr.bf16.mxu0 %v1808_v27  ;;  %v1858_v27 = vld [vmem:[%s2579_s1 + $0x194] ss:$8 sps:$4 sm:$0xff]  }
  0x27   :  { %1778 = vset.pattern.permute.xlu1 %v1968_v18  ;;  %v1841_v18 = vld [vmem:[%s2579_s1 + $0x140] ss:$8 sps:$4 sm:$0xff]  }
  0x28   :  { %95 = vperm.xlu1 %1778, %v2044_v9   ;;  %1036 = vmatpush1.bf16.msra.mxu1 %v1918_v59  ;;  %v1894_v59 = vld [vmem:[%s2579_s1 + $0x254] ss:$8 sps:$4 sm:$0xff]  }
  0x29   :  { %662 = vmatpush1.bf16.msra.mxu0 %v1810_v28  ;;  %1037 = vmatprep.subr.bf16.mxu1 %v1919_v61  ;;  %v1856_v28 = vld [vmem:[%s2579_s1 + $0x190] ss:$8 sps:$4 sm:$0xff]   ;;  %v1897_v61 = vld [vmem:[%s2579_s1 + $0x264] ss:$8 sps:$4 sm:$0xff]  }
  0x2a   :  { %663 = vmatprep.subr.bf16.mxu0 %v1811_v29  ;;  %v1861_v29 = vld [vmem:[%s2579_s1 + $0x1a4] ss:$8 sps:$4 sm:$0xff]  }
  0x2c   :  { %1779 = vset.pattern.permute.xlu1 %v1969_v25  ;;  %1038 = vmatpush1.bf16.msra.mxu1 %v1921_v3  ;;  %v1855_v25 = vld [vmem:[%s2579_s1 + $0x184] ss:$8 sps:$4 sm:$0xff]  }
  0x2d   :  { %138 = vperm.xlu1 %1779, %v2017_v2   ;;  %664 = vmatpush1.bf16.msra.mxu0 %v1813_v30  ;;  %v1859_v30 = vld [vmem:[%s2579_s1 + $0x1a0] ss:$8 sps:$4 sm:$0xff]  }
  0x2e   :  { %665 = vmatprep.subr.bf16.mxu0 %v1814_v31  ;;  %1039 = vmatprep.subr.bf16.mxu1 %v1922_v5  ;;  %v1864_v31 = vld [vmem:[%s2579_s1 + $0x1b4] ss:$8 sps:$4 sm:$0xff]  }
  0x30   :  { %1040 = vmatpush1.bf16.msra.mxu1 %v1924_v8  ;;  %v1930_v8 = vld [vmem:[%s2580_s2 + $0xd8] ss:$12 sps:$4 sm:$0xff]  }
  0x31   :  { %144 = vperm.xlu1 %1779, %v2036_v7   ;;  %666 = vmatpush1.bf16.msra.mxu0 %v1816_v32  ;;  %v1862_v32 = vld [vmem:[%s2579_s1 + $0x1b0] ss:$8 sps:$4 sm:$0xff]  }
  0x32   :  { %667 = vmatprep.subr.bf16.mxu0 %v1817_v33  ;;  %1041 = vmatprep.subr.bf16.mxu1 %v1925_v11  ;;  %v1867_v33 = vld [vmem:[%s2579_s1 + $0x1c4] ss:$8 sps:$4 sm:$0xff]  }
  0x34   :  { %1042 = vmatpush1.bf16.msra.mxu1 %v1927_v13 }
  0x35   :  { %147 = vperm.xlu1 %1779, %v2044_v9   ;;  %668 = vmatpush1.bf16.msra.mxu0 %v1819_v34  ;;  %v1835_v9 = vld [vmem:[%s2579_s1 + $0x120] ss:$8 sps:$4 sm:$0xff]  }
  0x36   :  { %669 = vmatprep.subr.bf16.mxu0 %v1820_v35  ;;  %v1865_v35 = vld [vmem:[%s2579_s1 + $0x1c0] ss:$8 sps:$4 sm:$0xff]  }
  0x39   :  { %670 = vmatpush1.bf16.msra.mxu0 %v1822_v36  ;;  %v1870_v36 = vld [vmem:[%s2579_s1 + $0x1d4] ss:$8 sps:$4 sm:$0xff]  }
  0x3a   :  { %671 = vmatprep.subr.bf16.mxu0 %v1823_v37  ;;  %v1868_v37 = vld [vmem:[%s2579_s1 + $0x1d0] ss:$8 sps:$4 sm:$0xff]  }
  0x3d   :  { %672 = vmatpush1.bf16.msra.mxu0 %v1825_v38  ;;  %v1873_v38 = vld [vmem:[%s2579_s1 + $0x1e4] ss:$8 sps:$4 sm:$0xff]  }
  0x3e   :  { %673 = vmatprep.subr.bf16.mxu0 %v1826_v39 }
  0x41   :  { %674 = vmatpush1.bf16.msra.mxu0 %v1828_v40  ;;  %v1871_v40 = vld [vmem:[%s2579_s1 + $0x1e0] ss:$8 sps:$4 sm:$0xff]  }
  0x42   :  { %696 = vmatprep.subr.bf16.mxu0 %v1831_v41  ;;  %v1876_v41 = vld [vmem:[%s2579_s1 + $0x1f4] ss:$8 sps:$4 sm:$0xff]  }
  0x81   :  { %v35_v54 = vpop.permute.xlu1 %34  ;;  %v61_v55 = vpop.permute.xlu0 %60 }
  0x82   :  { %vm45_vm0 = vcmp.eq.s32.totalorder %v2176_v52, %v35_v54  ;;  %vm71_vm3 = vcmp.eq.s32.totalorder %v2176_v52, %v61_v55  ;;  %v1883_v54 = vld [vmem:[%s2579_s1 + $0x220] ss:$8 sps:$4 sm:$0xff]   ;;  %v1888_v55 = vld [vmem:[%s2579_s1 + $0x234] ss:$8 sps:$4 sm:$0xff]  }
  0x85   :  { %v38_v57 = vpop.permute.xlu1 %37  ;;  %v64_v58 = vpop.permute.xlu0 %63 }
  0x86   :  { %vm46_vm1 = vcmp.eq.s32.totalorder %v2176_v52, %v38_v57  ;;  %vm72_vm2 = vcmp.eq.s32.totalorder %v2176_v52, %v64_v58  ;;  %v1891_v57 = vld [vmem:[%s2579_s1 + $0x244] ss:$8 sps:$4 sm:$0xff]   ;;  %v1889_v58 = vld [vmem:[%s2579_s1 + $0x240] ss:$8 sps:$4 sm:$0xff]  }
  0x87   :  { %vm1607_vm4 = vmpackc.low %vm46_vm1, %vm45_vm0 }
  0x88   :  { %vm1605_vm5 = vmpackc.low %vm72_vm2, %vm71_vm3 }
  0x89   :  { %1606 = vmatprep.mubr.msk.bf16.mxu0 %vm1605_vm5, %v1970_v63  ;;  %v67_v0 = vpop.permute.xlu0 %66 }
  0x8a   :  { %1608 = vmatmul.mubr.msk.bf16.vlgmr.msra.gmra.mrb[0].mxu0 %vm1607_vm4, %v1970_v63  ;;  %vm73_vm6 = vcmp.eq.s32.totalorder %v2176_v52, %v67_v0  ;;  %v70_v2 = vpop.permute.xlu1 %69  ;;  %v1895_v0 = vld [vmem:[%s2579_s1 + $0x260] ss:$8 sps:$4 sm:$0xff]  }
  0x8b   :  { %697 = vmatpush1.bf16.msra.mxu0 %v1829_v60  ;;  %vm74_vm7 = vcmp.eq.s32.totalorder %v2176_v52, %v70_v2  ;;  %v1892_v60 = vld [vmem:[%s2579_s1 + $0x250] ss:$8 sps:$4 sm:$0xff]   ;;  %v1900_v2 = vld [vmem:[%s2579_s1 + $0x274] ss:$8 sps:$4 sm:$0xff]  }
  0x8c   :  { %vm1609_vm8 = vmpackc.low %vm74_vm7, %vm73_vm6  ;;  %698 = vmatprep.subr.bf16.mxu0 %v1834_v62 }
  0x8d   :  { %1610 = vmatprep.mubr.msk.bf16.mxu0 %vm1609_vm8, %v1970_v63 }
  0x8e   :  { %v41_v7 = vpop.permute.xlu0 %40 }
  0x8f   :  { %699 = vmatpush1.bf16.msra.mxu0 %v1832_v4  ;;  %v44_v10 = vpop.permute.xlu1 %43  ;;  %vm47_vm9 = vcmp.eq.s32.totalorder %v2176_v52, %v41_v7  ;;  %v1898_v4 = vld [vmem:[%s2579_s1 + $0x270] ss:$8 sps:$4 sm:$0xff]   ;;  %v1928_v7 = vld [vmem:[%s2580_s2 + $0xdc] ss:$12 sps:$4 sm:$0xff]  }
  0x90   :  { %700 = vmatprep.subr.bf16.mxu0 %v1837_v6  ;;  %vm48_vm10 = vcmp.eq.s32.totalorder %v2176_v52, %v44_v10  ;;  %1043 = vmatprep.subr.bf16.mxu1 %v1928_v7  ;;  %v856_v7 = vld [vmem:[%s2582_s3 + $0x50] sm:$0xff] }
  0x91   :  { %vm1611_vm11 = vmpackc.low %vm48_vm10, %vm47_vm9  ;;  %1044 = vmatpush1.bf16.msra.mxu1 %v1930_v8 }
  0x92   :  { %1612 = vmatmul.mubr.msk.bf16.gmra.mrb[4].mxu0 %vm1611_vm11, %v1970_v63  ;;  %1078 = vmatprep.subr.bf16.mxu1 %v1966_v1 }
  0x93   :  { %701 = vmatpush1.bf16.msra.mxu0 %v1835_v9  ;;  %v116_v15 = vpop.permute.xlu0 %115 }
  0x94   :  { %702 = vmatprep.subr.bf16.mxu0 %v1840_v12  ;;  %v113_v17 = vpop.permute.xlu1 %112  ;;  %vm124_vm12 = vcmp.eq.s32.totalorder %v2176_v52, %v116_v15  ;;  %v1932_v15 = vld [vmem:[%s2580_s2 + $0x20] ss:$12 sps:$4 sm:$0xff]  }
  0x95   :  { %vm123_vm13 = vcmp.eq.s32.totalorder %v2176_v52, %v113_v17 }
  0x96   :  { %vm1613_vm14 = vmpackc.low %vm124_vm12, %vm123_vm13 }
  0x97   :  { %703 = vmatpush1.bf16.msra.mxu0 %v1838_v14  ;;  %1614 = vmatprep.mubr.msk.bf16.mxu0 %vm1613_vm14, %v1970_v63  ;;  %v119_v43 = vpop.permute.xlu0 %118  ;;  %vm1018_vm14 = vcmask 261120  }
  0x98   :  { %704 = vmatprep.subr.bf16.mxu0 %v1843_v16  ;;  %vm125_vm0 = vcmp.eq.s32.totalorder %v2176_v52, %v119_v43  ;;  %v1956_v43 = vld [vmem:[%s2581_s5 + $0x38] sm:$0xff]  }
  0x99   :  { %v87_v34 = vpop.permute.xlu1 %86 }
  0x9a   :  { %vm97_vm1 = vcmp.eq.s32.totalorder %v2176_v52, %v87_v34  ;;  %v1947_v34 = vld [vmem:[%s2581_s5 + $0x58] sm:$0xff]  }
  0x9b   :  { %705 = vmatpush1.bf16.msra.mxu0 %v1841_v18 }
  0x9c   :  { %706 = vmatprep.subr.bf16.mxu0 %v1846_v19  ;;  %v93_v49 = vpop.permute.xlu0 %92 }
  0x9d   :  { %v90_v39 = vpop.permute.xlu1 %89  ;;  %vm99_vm6 = vcmp.eq.s32.totalorder %v2176_v52, %v93_v49  ;;  %v847_v49 = vld [vmem:[%s2582_s3 + $0x8] sm:$0xff] }
  0x9e   :  { %vm98_vm2 = vcmp.eq.s32.totalorder %v2176_v52, %v90_v39  ;;  %v1952_v39 = vld [vmem:[%s2581_s5 + $0x28] sm:$0xff]  }
  0x9f   :  { %707 = vmatpush1.bf16.msra.mxu0 %v1844_v20  ;;  %vm1615_vm4 = vmpackc.low %vm98_vm2, %vm97_vm1  ;;  %vm1972_vm2 = vmmov 0  }
  0xa0   :  { %708 = vmatprep.subr.bf16.mxu0 %v1849_v21  ;;  %v1933_v21 = vld [vmem:[%s2580_s2 + $0x38] ss:$12 sps:$4 sm:$0xff]  }
  0xa1   :  { %v142_v3 = vpop.permute.xlu0 %141 }
  0xa2   :  { %v122_v42 = vpop.permute.xlu1 %121  ;;  %vm150_vm9 = vcmp.eq.s32.totalorder %v2176_v52, %v142_v3  ;;  %v855_v3 = vld [vmem:[%s2582_s3 + $0x48] sm:$0xff] }
  0xa3   :  { %709 = vmatpush1.bf16.msra.mxu0 %v1847_v22  ;;  %vm126_vm15 = vcmp.eq.s32.totalorder %v2176_v52, %v122_v42  ;;  %v1934_v22 = vld [vmem:[%s2580_s2 + $0x50] ss:$12 sps:$4 sm:$0xff]  }
  0xa4   :  { %710 = vmatprep.subr.bf16.mxu0 %v1852_v23  ;;  %vm1617_vm3 = vmpackc.low %vm126_vm15, %vm125_vm0  ;;  %v1935_v23 = vld [vmem:[%s2580_s2 + $0x68] ss:$12 sps:$4 sm:$0xff]   ;;  %v1955_v42 = vld [vmem:[%s2581_s5 + $0x78] sm:$0xff]   ;;  %vm1205_vm15 = vcmask 1041409   ;;  %vm1214_vm0 = vcmask 1041408  }
  0xa5   :  { %vm2515_vm1 = vmpackc.low %vm1214_vm0, %vm1214_vm0 }
  0xa7   :  { %711 = vmatpush1.bf16.msra.mxu0 %v1850_v24  ;;  %v96_v51 = vpop.permute.xlu1 %95  ;;  %v1936_v24 = vld [vmem:[%s2580_s2 + $0x80] ss:$12 sps:$4 sm:$0xff]  }
  0xa8   :  { %712 = vmatprep.subr.bf16.mxu0 %v1855_v25  ;;  %vm100_vm5 = vcmp.eq.s32.totalorder %v2176_v52, %v96_v51  ;;  %v1937_v25 = vld [vmem:[%s2580_s2 + $0x98] ss:$12 sps:$4 sm:$0xff]  }
  0xa9   :  { %vm1619_vm7 = vmpackc.low %vm100_vm5, %vm99_vm6  ;;  %v850_v51 = vld [vmem:[%s2582_s3 + $0x20] sm:$0xff] }
  0xab   :  { %713 = vmatpush1.bf16.msra.mxu0 %v1853_v26  ;;  %v1938_v26 = vld [vmem:[%s2580_s2 + $0xb0] ss:$12 sps:$4 sm:$0xff]  }
  0xac   :  { %714 = vmatprep.subr.bf16.mxu0 %v1858_v27  ;;  %v139_v62 = vpop.permute.xlu1 %138  ;;  %v1939_v27 = vld [vmem:[%s2580_s2 + $0xc8] ss:$12 sps:$4 sm:$0xff]  }
  0xad   :  { %vm149_vm8 = vcmp.eq.s32.totalorder %v2176_v52, %v139_v62 }
  0xae   :  { %vm1621_vm10 = vmpackc.low %vm150_vm9, %vm149_vm8 }
  0xaf   :  { %715 = vmatpush1.bf16.msra.mxu0 %v1856_v28  ;;  %v1940_v28 = vld [vmem:[%s2580_s2 + $0xe0] ss:$12 sps:$4 sm:$0xff]  }
  0xb0   :  { %716 = vmatprep.subr.bf16.mxu0 %v1861_v29  ;;  %v145_v5 = vpop.permute.xlu1 %144  ;;  %v1941_v29 = vld [vmem:[%s2581_s5 + $0x40] sm:$0xff]  }
  0xb1   :  { %vm151_vm11 = vcmp.eq.s32.totalorder %v2176_v52, %v145_v5  ;;  %v853_v5 = vld [vmem:[%s2582_s3 + $0x38] sm:$0xff] }
  0xb3   :  { %717 = vmatpush1.bf16.msra.mxu0 %v1859_v30  ;;  %v1942_v30 = vld [vmem:[%s2581_s5] sm:$0xff]  }
  0xb4   :  { %718 = vmatprep.subr.bf16.mxu0 %v1864_v31  ;;  %v148_v6 = vpop.permute.xlu1 %147  ;;  %v1943_v31 = vld [vmem:[%s2581_s5 + $0x48] sm:$0xff]  }
  0xb5   :  { %vm152_vm12 = vcmp.eq.s32.totalorder %v2176_v52, %v148_v6 }
  0xb6   :  { %vm1623_vm13 = vmpackc.low %vm152_vm12, %vm151_vm11 }
  0xb7   :  { %719 = vmatpush1.bf16.msra.mxu0 %v1862_v32  ;;  %v1945_v32 = vld [vmem:[%s2581_s5 + $0x50] sm:$0xff]  }
  0xb8   :  { %720 = vmatprep.subr.bf16.mxu0 %v1867_v33  ;;  %v1946_v33 = vld [vmem:[%s2581_s5 + $0x10] sm:$0xff]  }
  0xbb   :  { %721 = vmatpush1.bf16.msra.mxu0 %v1865_v35  ;;  %v1948_v35 = vld [vmem:[%s2581_s5 + $0x18] sm:$0xff]  }
  0xbc   :  { %722 = vmatprep.subr.bf16.mxu0 %v1870_v36  ;;  %v1949_v36 = vld [vmem:[%s2581_s5 + $0x60] sm:$0xff]  }
  0xbf   :  { %723 = vmatpush1.bf16.msra.mxu0 %v1868_v37  ;;  %v1950_v37 = vld [vmem:[%s2581_s5 + $0x20] sm:$0xff]  }
  0xc0   :  { %724 = vmatprep.subr.bf16.mxu0 %v1873_v38  ;;  %v1951_v38 = vld [vmem:[%s2581_s5 + $0x68] sm:$0xff]  }
  0xc3   :  { %725 = vmatpush1.bf16.msra.mxu0 %v1871_v40  ;;  %v1953_v40 = vld [vmem:[%s2581_s5 + $0x70] sm:$0xff]  }
  0xc4   :  { %726 = vmatprep.subr.bf16.mxu0 %v1876_v41  ;;  %v1954_v41 = vld [vmem:[%s2581_s5 + $0x30] sm:$0xff]  }
  0xc7   :  { %727 = vmatpush1.bf16.msra.mxu0 %v1874_v44  ;;  %v1971_v44 = vmov 0.0  }
  0xc8   :  { %749 = vmatprep.subr.bf16.mxu0 %v1879_v45  ;;  %v846_v45 = vld [vmem:[%s2582_s3] sm:$0xff] }
  0xca   :  { %1616 = vmatmul.mubr.msk.bf16.vlgmr.msra.gmra.mrb[0].mxu0 %vm1615_vm4, %v1970_v63 }
  0xcb   :  { %1618 = vmatprep.mubr.msk.bf16.mxu0 %vm1617_vm3, %v1970_v63  ;;  %750 = vmatpush1.bf16.msra.mxu0 %v1877_v46 }
  0xcc   :  { %751 = vmatprep.subr.bf16.mxu0 %v1882_v47  ;;  %v849_v47 = vld [vmem:[%s2582_s3 + $0x18] sm:$0xff] }
  0xcf   :  { %752 = vmatpush1.bf16.msra.mxu0 %v1880_v50 }
  0xd0   :  { %753 = vmatprep.subr.bf16.mxu0 %v1885_v53 }
  0xd2   :  { %1620 = vmatmul.mubr.msk.bf16.gmra.mrb[4].mxu0 %vm1619_vm7, %v1970_v63 }
  0xd3   :  { %754 = vmatpush1.bf16.msra.mxu0 %v1883_v54  ;;  %781 = vmatprep.mubr.bf16.mxu0 %v1966_v1 }
  0xd4   :  { %755 = vmatprep.subr.bf16.mxu0 %v1888_v55 }
  0xd7   :  { %756 = vmatpush1.bf16.msra.mxu0 %v1886_v56 }
  0xd8   :  { %757 = vmatprep.subr.bf16.mxu0 %v1891_v57 }
  0xdb   :  { %758 = vmatpush1.bf16.msra.mxu0 %v1889_v58 }
  0xdc   :  { %759 = vmatprep.subr.bf16.mxu0 %v1894_v59 }
  0xdf   :  { %760 = vmatpush1.bf16.msra.mxu0 %v1892_v60 }
  0xe0   :  { %761 = vmatprep.subr.bf16.mxu0 %v1897_v61 }
  0xe3   :  { %762 = vmatpush1.bf16.msra.mxu0 %v1895_v0  ;;  %v852_v0 = vld [vmem:[%s2582_s3 + $0x30] sm:$0xff] }
  0xe4   :  { %763 = vmatprep.subr.bf16.mxu0 %v1900_v2 }
  0xe7   :  { %764 = vmatpush1.bf16.msra.mxu0 %v1898_v4 }
  0xea   :  { %1622 = vmatmul.mubr.msk.bf16.vlgmr.msra.gmra.mrb[0].mxu0 %vm1621_vm10, %v1970_v63 }
  0xeb   :  { %791 = vmatprep.mubr.bf16.mxu0 %v1966_v1 }
  0xf2   :  { %1624 = vmatmul.mubr.msk.bf16.gmra.mrb[4].mxu0 %vm1623_vm13, %v1970_v63  ;;  %v1931_v63 = vld [vmem:[%s2580_s2 + $0x8] ss:$12 sps:$4 sm:$0xff]  }
 0x1bd   :  { %v783_v9 = vpop.f32.mrb[0].mxu0 }
 0x1be   :  { %v785_v10 = vpop.f32.mrb[1].mxu0 }
 0x1bf   :  { %v787_v11 = vpop.f32.mrb[2].mxu0 }
 0x1c0   :  { %v802_v12 = vpack.c.bf16 %v787_v11, %v783_v9  ;;  %v789_v52 = vpop.f32.mrb[3].mxu0 }
 0x1c1   :  { %v803_v13 = vpack.c.bf16 %v789_v52, %v785_v10 }
 0x1c3   :  { %1655 = vmatprep.mubr.msk.bf16.mxu1 %vm1018_vm14, %v803_v13 }
 0x1c4   :  { %1058 = vmatmul.mubr.bf16.vlgmr.msra.gmra.mrb[0].mxu1 %v802_v12 }
 0x1c5   :  { %1079 = vmatpush1.bf16.msra.mxu1 %v1931_v63  ;;  %v793_v14 = vpop.f32.mrb[4].mxu0 }
 0x1c6   :  { %v795_v16 = vpop.f32.mrb[5].mxu0  ;;  %1080 = vmatprep.subr.bf16.mxu1 %v1966_v1 }
 0x1c7   :  { %v797_v17 = vpop.f32.mrb[6].mxu0 }
 0x1c8   :  { %v804_v18 = vpack.c.bf16 %v797_v17, %v793_v14  ;;  %v799_v19 = vpop.f32.mrb[7].mxu0 }
 0x1c9   :  { %v805_v20 = vpack.c.bf16 %v799_v19, %v795_v16  ;;  %1081 = vmatpush1.bf16.msra.mxu1 %v1932_v15 }
 0x1ca   :  { %1082 = vmatprep.subr.bf16.mxu1 %v1966_v1 }
 0x1cb   :  { %1656 = vmatprep.mubr.msk.bf16.mxu1 %vm1018_vm14, %v805_v20 }
 0x1cc   :  { %1068 = vmatmul.mubr.bf16.gmra.mrb[4].mxu1 %v804_v18 }
 0x1cd   :  { %1083 = vmatpush1.bf16.msra.mxu1 %v1933_v21  ;;  %1657 = vmatprep.mubr.msk.bf16.mxu1 %vm1018_vm14, %v803_v13 }
 0x1ce   :  { %1084 = vmatprep.subr.bf16.mxu1 %v1966_v1 }
 0x1d1   :  { %1085 = vmatpush1.bf16.msra.mxu1 %v1934_v22 }
 0x1d2   :  { %1086 = vmatprep.subr.bf16.mxu1 %v1966_v1 }
 0x1d5   :  { %1087 = vmatpush1.bf16.msra.mxu1 %v1935_v23 }
 0x1d6   :  { %1088 = vmatprep.subr.bf16.mxu1 %v1966_v1 }
 0x1d9   :  { %1089 = vmatpush1.bf16.msra.mxu1 %v1936_v24 }
 0x1da   :  { %1090 = vmatprep.subr.bf16.mxu1 %v1966_v1 }
 0x1dd   :  { %1091 = vmatpush1.bf16.msra.mxu1 %v1937_v25 }
 0x1de   :  { %1092 = vmatprep.subr.bf16.mxu1 %v1966_v1 }
 0x1e1   :  { %1093 = vmatpush1.bf16.msra.mxu1 %v1938_v26 }
 0x1e2   :  { %1094 = vmatprep.subr.bf16.mxu1 %v1966_v1 }
 0x1e5   :  { %1095 = vmatpush1.bf16.msra.mxu1 %v1939_v27  ;;  %v2508_v27 = vld [vmem:[%s2583_s4] sm:$0x7] }
 0x1e6   :  { %1096 = vmatprep.subr.bf16.mxu1 %v1966_v1  ;;  %v1944_v1 = vld [vmem:[%s2581_s5 + $0x8] sm:$0xff]  }
 0x1e9   :  { %1097 = vmatpush1.bf16.msra.mxu1 %v1940_v28 }
 0x1ea   :  { %1693 = vmatprep.subr.bf16.mxu1 %v1941_v29 }
 0x1ec   :  { %1111 = vmatmul.mubr.bf16.vlgmr.msra.gmra.mrb[8].mxu1 %v802_v12 }
 0x1ed   :  { %1658 = vmatprep.mubr.msk.bf16.mxu1 %vm1018_vm14, %v805_v20  ;;  %1694 = vmatpush3.bf16.msra.mxu1 %v1942_v30 }
 0x1ee   :  { %1695 = vmatprep.subr.bf16.mxu1 %v1943_v31 }
 0x1f1   :  { %1696 = vmatpush3.bf16.msra.mxu1 %v1944_v1 }
 0x1f2   :  { %1697 = vmatprep.subr.bf16.mxu1 %v1945_v32 }
 0x1f4   :  { %1119 = vmatmul.mubr.bf16.gmra.mrb[12].mxu1 %v804_v18  ;;  %v2502_v18 = vshrl.u32 %v31_v48, 7 }
 0x1f5   :  { %1698 = vmatpush3.bf16.msra.mxu1 %v1946_v33 }
 0x1f6   :  { %1699 = vmatprep.subr.bf16.mxu1 %v1947_v34  ;;  %v1173_v25 = vsub.s32 0, %v2502_v18  ;;  %v1177_v29 = vsub.s32 1, %v2502_v18 }
 0x1f8   :  { %v1174_v32 = vrot.slane %v2508_v27, %v1173_v25  ;;  %v1181_v25 = vsub.s32 2, %v2502_v18 }
 0x1f9   :  { %1700 = vmatpush3.bf16.msra.mxu1 %v1948_v35  ;;  %v1178_v35 = vrot.slane %v2508_v27, %v1177_v29 }
 0x1fa   :  { %1701 = vmatprep.subr.bf16.mxu1 %v1949_v36 }
 0x1fd   :  { %1702 = vmatpush3.bf16.msra.mxu1 %v1950_v37 }
 0x1fe   :  { %1703 = vmatprep.subr.bf16.mxu1 %v1951_v38 }
 0x201   :  { %1704 = vmatpush3.bf16.msra.mxu1 %v1952_v39 }
 0x202   :  { %1705 = vmatprep.subr.bf16.mxu1 %v1953_v40 }
 0x205   :  { %1706 = vmatpush3.bf16.msra.mxu1 %v1954_v41 }
 0x206   :  { %1707 = vmatprep.subr.bf16.mxu1 %v1955_v42 }
 0x209   :  { %1708 = vmatpush3.bf16.msra.mxu1 %v1956_v43 }
 0x20a   :  { %1724 = vmatprep.subr.bf16.mxu1 %v1971_v44 }
 0x297   :  { %v1059_v46 = vpop.f32.mrb[0].mxu1 }
 0x298   :  { %v1061_v50 = vpop.f32.mrb[1].mxu1  ;;  %v1060_v54 = vadd.f32 %v1059_v46, %v846_v45 }
 0x299   :  { %v1063_v53 = vpop.f32.mrb[2].mxu1  ;;  %v1062_v57 = vadd.f32 %v1061_v50, %v847_v49 }
 0x29a   :  { %v1064_v55 = vadd.f32 %v1063_v53, %v849_v47  ;;  %v1065_v56 = vpop.f32.mrb[3].mxu1 }
 0x29b   :  { %v1066_v58 = vadd.f32 %v1065_v56, %v850_v51  ;;  %v1957_v56 = vld [vmem:[%s2581_s5 + $0x80] sm:$0xff]  }
 0x29c   :  { %v1127_v59 = vmax.f32 %v1060_v54, %v1064_v55 }
 0x29d   :  { %v1134_v60 = vmax.f32 %v1062_v57, %v1066_v58  ;;  %v1958_v58 = vld [vmem:[%s2581_s5 + $0x88] sm:$0xff]  }
 0x29e   :  { %v1128_v61 = vrot.slane %v1127_v59, 4 }
 0x29f   :  { %v1135_v62 = vrot.slane %v1134_v60, 4  ;;  %v1069_v2 = vpop.f32.mrb[4].mxu1 }
 0x2a0   :  { %v1129_v4 = vmax.f32 %v1127_v59, %v1128_v61  ;;  %v1071_v6 = vpop.f32.mrb[5].mxu1  ;;  %v1070_v11 = vadd.f32 %v1069_v2, %v852_v0  ;;  %v848_v59 = vld [vmem:[%s2582_s3 + $0x10] sm:$0xff]  ;;  %v851_v61 = vld [vmem:[%s2582_s3 + $0x28] sm:$0xff] }
 0x2a1   :  { %v1136_v8 = vmax.f32 %v1134_v60, %v1135_v62  ;;  %v1073_v9 = vpop.f32.mrb[6].mxu1  ;;  %v1072_v63 = vadd.f32 %v1071_v6, %v853_v5  ;;  %v1959_v5 = vld [vmem:[%s2581_s5 + $0x90] sm:$0xff]  }
 0x2a2   :  { %v1130_v10 = vrot.slane %v1129_v4, 2  ;;  %v1074_v12 = vadd.f32 %v1073_v9, %v855_v3  ;;  %v1075_v52 = vpop.f32.mrb[7].mxu1  ;;  %v854_v9 = vld [vmem:[%s2582_s3 + $0x40] sm:$0xff] }
 0x2a3   :  { %v1137_v13 = vrot.slane %v1136_v8, 2  ;;  %v1076_v14 = vadd.f32 %v1075_v52, %v856_v7 }
 0x2a4   :  { %v1148_v15 = vmax.f32 %v1070_v11, %v1074_v12  ;;  %v1131_v17 = vmax.f32 %v1129_v4, %v1130_v10  ;;  %v857_v11 = vld [vmem:[%s2582_s3 + $0x58] sm:$0xff] }
 0x2a5   :  { %v1155_v16 = vmax.f32 %v1072_v63, %v1076_v14  ;;  %v1138_v20 = vmax.f32 %v1136_v8, %v1137_v13  ;;  %v1960_v8 = vld [vmem:[%s2581_s5 + $0x98] sm:$0xff]  }
 0x2a6   :  { %v1149_v19 = vrot.slane %v1148_v15, 4  ;;  %v1132_v24 = vrot.slane %v1131_v17, 1 }
 0x2a7   :  { %v1156_v21 = vrot.slane %v1155_v16, 4  ;;  %v1139_v28 = vrot.slane %v1138_v20, 1 }
 0x2a8   :  { %v1150_v22 = vmax.f32 %v1148_v15, %v1149_v19  ;;  %v1133_v1 = vmax.f32 %v1131_v17, %v1132_v24  ;;  %v1961_v17 = vld [vmem:[%s2581_s5 + $0xa0] sm:$0xff]  }
 0x2a9   :  { %v1157_v23 = vmax.f32 %v1155_v16, %v1156_v21  ;;  %v1140_v34 = vmax.f32 %v1138_v20, %v1139_v28  ;;  %v1963_v28 = vld [vmem:[%s2581_s5 + $0xb0] sm:$0xff]  }
 0x2aa   :  { %v1151_v26 = vrot.slane %v1150_v22, 2  ;;  %v1186_v39 = vadd.f32 %v1174_v32, %v1133_v1  ;;  %v1964_v1 = vld [vmem:[%s2581_s5 + $0xb8] sm:$0xff]  }
 0x2ab   :  { %v1158_v30 = vrot.slane %v1157_v23, 2  ;;  %v1187_v41 = vadd.f32 %v1178_v35, %v1140_v34 }
 0x2ac   :  { %v1152_v48 = vmax.f32 %v1150_v22, %v1151_v26  ;;  %v1192_v46 = vmax.f32 %v1186_v39, 0.0  ;;  %v1962_v22 = vld [vmem:[%s2581_s5 + $0xa8] sm:$0xff]  }
 0x2ad   :  { %v1159_v31 = vmax.f32 %v1157_v23, %v1158_v30  ;;  %v1193_v49 = vmax.f32 %v1187_v41, 0.0 }
 0x2ae   :  { %v1153_v33 = vrot.slane %v1152_v48, 1 }
 0x2af   :  { %v1160_v36 = vrot.slane %v1159_v31, 1 }
 0x2b0   :  { %v1154_v37 = vmax.f32 %v1152_v48, %v1153_v33  ;;  %v1182_v48 = vrot.slane %v2508_v27, %v1181_v25 }
 0x2b1   :  { %v1161_v38 = vmax.f32 %v1159_v31, %v1160_v36 }
 0x2b2   :  { %v1189_v40 = vadd.f32 %v1174_v32, %v1154_v37 }
 0x2b3   :  { %v1190_v42 = vadd.f32 %v1178_v35, %v1161_v38 }
 0x2b4   :  { %v1195_v43 = vmax.f32 %v1189_v40, 0.0 }
 0x2b5   :  { %v1196_v45 = vmax.f32 %v1190_v42, 0.0 }
 0x2b6   :  { %v1204_v47 = vrot.slane %v1195_v43, 7 }
 0x2b7   :  { %v1207_v50 = vrot.slane %v1196_v45, 7 }
 0x2b8   :  { %v1206_v51 = vsel %vm1205_vm15, %v1204_v47, %v1192_v46 }
 0x2b9   :  { %v1208_v53 = vsel %vm1205_vm15, %v1207_v50, %v1193_v49  ;;  %v1688_v57 = vpack.c.bf16 %v1206_v51, %v1206_v51 }
 0x2ba   :  { %v1685_v55 = vpack.c.bf16 %v1208_v53, %v1208_v53 }
 0x2bc   :  { %1686 = vmatprep.mubr.msk.bf16.mxu1 %vm2515_vm1, %v1685_v55 }
 0x2bd   :  { %1689 = vmatmul.mubr.msk.bf16.vlgmr.msra.gmra.mrb[16].mxu1 %vm2515_vm1, %v1688_v57 }
 0x2be   :  { %1725 = vmatpush3.bf16.msra.mxu1 %v1957_v56  ;;  %1740 = vmatprep.mubr.msk.bf16.mxu1 %vm1972_vm2, %v1971_v44 }
 0x2bf   :  { %v1112_v60 = vpop.f32.mrb[8].mxu1  ;;  %1726 = vmatprep.subr.bf16.mxu1 %v1971_v44 }
 0x2c0   :  { %v1114_v62 = vpop.f32.mrb[9].mxu1  ;;  %v1113_v2 = vadd.f32 %v1112_v60, %v848_v59 }
 0x2c1   :  { %v1115_v0 = vpop.f32.mrb[10].mxu1 }
 0x2c2   :  { %v1116_v3 = vadd.f32 %v1115_v0, %v851_v61  ;;  %v1117_v4 = vpop.f32.mrb[11].mxu1  ;;  %1727 = vmatpush3.bf16.msra.mxu1 %v1958_v58 }
 0x2c3   :  { %1728 = vmatprep.subr.bf16.mxu1 %v1971_v44 }
 0x2c4   :  { %v1141_v6 = vmax.f32 %v1113_v2, %v1116_v3 }
 0x2c6   :  { %v1142_v7 = vrot.slane %v1141_v6, 4  ;;  %1729 = vmatpush3.bf16.msra.mxu1 %v1959_v5 }
 0x2c7   :  { %v1120_v10 = vpop.f32.mrb[12].mxu1  ;;  %1730 = vmatprep.subr.bf16.mxu1 %v1971_v44 }
 0x2c8   :  { %v1143_v12 = vmax.f32 %v1141_v6, %v1142_v7  ;;  %v1122_v52 = vpop.f32.mrb[13].mxu1  ;;  %v1121_v14 = vadd.f32 %v1120_v10, %v854_v9 }
 0x2c9   :  { %v1123_v13 = vpop.f32.mrb[14].mxu1 }
 0x2ca   :  { %v1144_v63 = vrot.slane %v1143_v12, 2  ;;  %v1124_v15 = vadd.f32 %v1123_v13, %v857_v11  ;;  %v1125_v16 = vpop.f32.mrb[15].mxu1  ;;  %1731 = vmatpush3.bf16.msra.mxu1 %v1960_v8 }
 0x2cb   :  { %1732 = vmatprep.subr.bf16.mxu1 %v1971_v44 }
 0x2cc   :  { %v1162_v19 = vmax.f32 %v1121_v14, %v1124_v15  ;;  %v1145_v20 = vmax.f32 %v1143_v12, %v1144_v63 }
 0x2ce   :  { %v1163_v21 = vrot.slane %v1162_v19, 4  ;;  %1733 = vmatpush3.bf16.msra.mxu1 %v1961_v17  ;;  %v1146_v24 = vrot.slane %v1145_v20, 1 }
 0x2cf   :  { %1734 = vmatprep.subr.bf16.mxu1 %v1971_v44 }
 0x2d0   :  { %v1164_v23 = vmax.f32 %v1162_v19, %v1163_v21  ;;  %v1147_v30 = vmax.f32 %v1145_v20, %v1146_v24 }
 0x2d2   :  { %v1165_v26 = vrot.slane %v1164_v23, 2  ;;  %1735 = vmatpush3.bf16.msra.mxu1 %v1962_v22  ;;  %v1188_v32 = vadd.f32 %v1182_v48, %v1147_v30 }
 0x2d3   :  { %1736 = vmatprep.subr.bf16.mxu1 %v1971_v44 }
 0x2d4   :  { %v1166_v29 = vmax.f32 %v1164_v23, %v1165_v26  ;;  %v1194_v35 = vmax.f32 %v1188_v32, 0.0 }
 0x2d6   :  { %v1167_v31 = vrot.slane %v1166_v29, 1  ;;  %1737 = vmatpush3.bf16.msra.mxu1 %v1963_v28 }
 0x2d7   :  { %1738 = vmatprep.subr.bf16.mxu1 %v1971_v44  ;;  %v1659_v44 = vld [vmem:[%s2584_s6] ss:$0 sm:$0xff] }
 0x2d8   :  { %v1168_v18 = vmax.f32 %v1166_v29, %v1167_v31 }
 0x2da   :  { %v1191_v33 = vadd.f32 %v1182_v48, %v1168_v18  ;;  %1739 = vmatpush3.bf16.msra.mxu1 %v1964_v1 }
 0x2dc   :  { %v1197_v34 = vmax.f32 %v1191_v33, 0.0 }
 0x2de   :  { %v1209_v36 = vrot.slane %v1197_v34, 7 }
 0x2e0   :  { %v1210_v37 = vsel %vm1205_vm15, %v1209_v36, %v1194_v35 }
 0x2e1   :  { %v1691_v38 = vpack.c.bf16 %v1210_v37, %v1210_v37 }
 0x2e3   :  { %1741 = vmatmul.mubr.msk.bf16.vlgmr.msra.gmra.mrb[20].mxu1 %vm2515_vm1, %v1691_v38 }
 0x390   :  { %v1709_v27 = vpop.f32.mrb[16].mxu1 }
 0x391   :  { %v1710_v39 = vpop.f32.mrb[17].mxu1 }
 0x392   :  { %v1711_v40 = vadd.f32 %v1710_v39, %v1709_v27  ;;  %v1712_v41 = vpop.f32.mrb[18].mxu1 }
 0x393   :  { %v1713_v42 = vpop.f32.mrb[19].mxu1 }
 0x394   :  { %v1455_v43 = vadd.f32 %v1711_v40, %v1659_v44 }
 0x3b6   :  { %v1494_v45 = vpop.f32.mrb[20].mxu1 }
 0x3b7   :  { %v1495_v46 = vadd.f32 %v1494_v45, %v1455_v43  ;;  %v1742_v47 = vpop.f32.mrb[21].mxu1 }
 0x3b8   :  { %v1497_v49 = vpop.f32.mrb[22].mxu1 }
 0x3b9   :  { %1500 = vst [vmem:[%s2585_s7] sm:$0xff] %v1495_v46  ;;  %v1743_v50 = vpop.f32.mrb[23].mxu1 }

</bundles_post_ra>
